<compile_context>
chip_gen: v6e
topology: v6e:2x2x1
jax: 0.10.0
libtpu: 0.0.40
codegen_flags: <defaults>
</compile_context>

<pallas_src>
import functools

import jax
import jax.numpy as jnp
from jax import lax
from jax.experimental import pallas as pl
from jax.experimental.pallas import tpu as pltpu


def _layernorm_kernel(x_ref, w_ref, *rest, with_bias, inv_c, eps):
    # x_ref: (1, C, T)   w_ref (C, 1)   [b_ref (C, 1)]   o_ref: (1, C, T)
    if with_bias:
        b_ref, o_ref = rest
    else:
        (o_ref,) = rest

    xf = x_ref[0].astype(jnp.float32)                        # single read, (C, T)
    # One-pass statistics over the channel (sublane) axis, per lane.
    mu = jnp.sum(xf, axis=0, keepdims=True) * inv_c          # (1, T)
    ex2 = jnp.sum(xf * xf, axis=0, keepdims=True) * inv_c    # (1, T)
    var = ex2 - mu * mu
    inv = lax.rsqrt(var + eps)                               # EUP slot, (1, T)

    w = w_ref[...].astype(jnp.float32)                       # (C, 1) lane-broadcast
    if with_bias:
        b = rest[0][...].astype(jnp.float32)                 # (C, 1)
        y = (xf - mu) * inv * w + b
    else:
        # BiasFree: variance uses the mean, but the output is NOT mean-centred.
        y = xf * inv * w
    o_ref[0] = y.astype(o_ref.dtype)


def _pick_tile(hw, c, in_itemsize):
    """Lane-dense spatial tile: multiple of 128, capped for VMEM budget."""
    if hw <= 128:
        return hw                       # full-extent (always legal)
    t = 1024                            # roofline already saturates by 512-1024
    # Rough per-step VMEM: in+out double-buffered (4 * C*T*itemsize)
    # plus ~3 f32 (C, T) temporaries  ->  C*T*(4*itemsize + 12) bytes.
    budget = 12 << 20
    while t > 128 and c * t * (4 * in_itemsize + 12) > budget:
        t //= 2
    # No point making the tile larger than the (128-padded) spatial extent.
    t = min(t, pl.cdiv(hw, 128) * 128)
    return t


def restormer_layernorm(x_nchw, weight, bias=None, ln_type="WithBias"):
    """x_nchw: (N, C, H, W); weight/bias: (C,). Returns (N, C, H, W)."""
    N, C, H, W = x_nchw.shape
    HW = H * W
    T = _pick_tile(HW, C, jnp.dtype(x_nchw.dtype).itemsize)
    grid = (N, pl.cdiv(HW, T))

    with_bias = (ln_type != "BiasFree")
    x_flat = x_nchw.reshape(N, C, HW)              # contiguous, free
    w2d = weight.reshape(C, 1)

    kernel = functools.partial(_layernorm_kernel, with_bias=with_bias,
                               inv_c=1.0 / C, eps=1e-5)

    in_specs = [
        pl.BlockSpec((1, C, T), lambda n, t: (n, 0, t)),
        pl.BlockSpec((C, 1), lambda n, t: (0, 0)),   # grid-invariant, resident
    ]
    operands = [x_flat, w2d]
    if with_bias:
        in_specs.append(pl.BlockSpec((C, 1), lambda n, t: (0, 0)))
        operands.append(bias.reshape(C, 1))

    y_flat = pl.pallas_call(
        kernel,
        out_shape=jax.ShapeDtypeStruct((N, C, HW), x_nchw.dtype),
        grid=grid,
        in_specs=in_specs,
        out_specs=pl.BlockSpec((1, C, T), lambda n, t: (n, 0, t)),
        compiler_params=pltpu.CompilerParams(
            dimension_semantics=("parallel", "parallel")),
    )(*operands)

    return y_flat.reshape(N, C, H, W)


def _reference_layernorm(x, weight, bias, ln_type):
    # Pure-JAX mirror of the PyTorch module (to_3d -> LayerNorm -> to_4d).
    N, C, H, W = x.shape
    x3 = jnp.transpose(x, (0, 2, 3, 1)).reshape(N, H * W, C).astype(jnp.float32)
    mu = jnp.mean(x3, axis=-1, keepdims=True)
    var = jnp.mean((x3 - mu) ** 2, axis=-1, keepdims=True)
    if ln_type == "BiasFree":
        y = x3 / jnp.sqrt(var + 1e-5) * weight
    else:
        y = (x3 - mu) / jnp.sqrt(var + 1e-5) * weight + bias
    y = y.reshape(N, H, W, C)
    return jnp.transpose(y, (0, 3, 1, 2)).astype(x.dtype)


if __name__ == "__main__":
    key = jax.random.PRNGKey(0)
    kx, kw, kb, kx2 = jax.random.split(key, 4)

    N, C, H, W = 2, 4, 16, 16
    x = jax.random.normal(kx, (N, C, H, W), dtype=jnp.float32)
    weight = 1.0 + 0.1 * jax.random.normal(kw, (C,), dtype=jnp.float32)
    bias = 0.1 * jax.random.normal(kb, (C,), dtype=jnp.float32)

    # WithBias variant
    out_wb = jax.block_until_ready(
        restormer_layernorm(x, weight, bias, ln_type="WithBias"))
    ref_wb = _reference_layernorm(x, weight, bias, "WithBias")
    assert out_wb.shape == (N, C, H, W), out_wb.shape
    assert jnp.allclose(out_wb, ref_wb, atol=1e-4, rtol=1e-4)

    # BiasFree variant (no bias operand is passed to the kernel)
    out_bf = jax.block_until_ready(
        restormer_layernorm(x, weight, None, ln_type="BiasFree"))
    ref_bf = _reference_layernorm(x, weight, None, "BiasFree")
    assert jnp.allclose(out_bf, ref_bf, atol=1e-4, rtol=1e-4)

    # Ragged spatial extent (HW not a multiple of 128): exercises the masked
    # last tile path that replaced the old full-HW fallback.
    H2, W2 = 10, 13
    x2 = jax.random.normal(kx2, (N, C, H2, W2), dtype=jnp.float32)
    out_rg = jax.block_until_ready(
        restormer_layernorm(x2, weight, bias, ln_type="WithBias"))
    ref_rg = _reference_layernorm(x2, weight, bias, "WithBias")
    assert jnp.allclose(out_rg, ref_rg, atol=1e-4, rtol=1e-4)

    print("KERNEL_OK")
</pallas_src>

<mosaic_0001>
module attributes {stable_mosaic.version = 11 : i64} {
  func.func @_layernorm_kernel(%arg0: i32, %arg1: i32, %arg2: memref<1x4x256xf32, #tpu.memory_space<vmem>>, %arg3: memref<4x1xf32, #tpu.memory_space<vmem>>, %arg4: memref<4x1xf32, #tpu.memory_space<vmem>>, %arg5: memref<1x4x256xf32, #tpu.memory_space<vmem>>) attributes {dimension_semantics = [#tpu.dimension_semantics<parallel>, #tpu.dimension_semantics<parallel>], iteration_bounds = array<i64: 2, 1>, scalar_prefetch = 0 : i64, scratch_operands = 0 : i64, tpu.core_type = #tpu.core_type<tc>, window_params = [{transform_indices = @transform_0, window_bounds = array<i64: 1, 4, 256>}, {pipeline_mode = #tpu.pipeline_mode<synchronous>, transform_indices = @transform_1, window_bounds = array<i64: 4, 1>}, {pipeline_mode = #tpu.pipeline_mode<synchronous>, transform_indices = @transform_2, window_bounds = array<i64: 4, 1>}, {transform_indices = @transform_3, window_bounds = array<i64: 1, 4, 256>}]} {
    %c0 = arith.constant 0 : index
    %c0_0 = arith.constant 0 : index
    %c0_1 = arith.constant 0 : index
    %0 = vector.load %arg2[%c0, %c0_0, %c0_1] : memref<1x4x256xf32, #tpu.memory_space<vmem>>, vector<1x4x256xf32>
    %1 = vector.shape_cast %0 : vector<1x4x256xf32> to vector<4x256xf32>
    %cst = arith.constant dense<0.000000e+00> : vector<256xf32>
    %2 = vector.multi_reduction <add>, %1, %cst [0] : vector<4x256xf32> to vector<256xf32>
    %3 = vector.shape_cast %2 : vector<256xf32> to vector<1x256xf32>
    %cst_2 = arith.constant 2.500000e-01 : f32
    %4 = vector.broadcast %cst_2 : f32 to vector<1x256xf32>
    %5 = arith.mulf %3, %4 : vector<1x256xf32>
    %6 = arith.mulf %1, %1 : vector<4x256xf32>
    %cst_3 = arith.constant dense<0.000000e+00> : vector<256xf32>
    %7 = vector.multi_reduction <add>, %6, %cst_3 [0] : vector<4x256xf32> to vector<256xf32>
    %8 = vector.shape_cast %7 : vector<256xf32> to vector<1x256xf32>
    %cst_4 = arith.constant 2.500000e-01 : f32
    %9 = vector.broadcast %cst_4 : f32 to vector<1x256xf32>
    %10 = arith.mulf %8, %9 : vector<1x256xf32>
    %11 = arith.mulf %5, %5 : vector<1x256xf32>
    %12 = arith.subf %10, %11 : vector<1x256xf32>
    %cst_5 = arith.constant 9.99999974E-6 : f32
    %13 = vector.broadcast %cst_5 : f32 to vector<1x256xf32>
    %14 = arith.addf %12, %13 : vector<1x256xf32>
    %15 = math.rsqrt %14 : vector<1x256xf32>
    %c0_6 = arith.constant 0 : index
    %c0_7 = arith.constant 0 : index
    %16 = vector.load %arg3[%c0_6, %c0_7] : memref<4x1xf32, #tpu.memory_space<vmem>>, vector<4x1xf32>
    %c0_8 = arith.constant 0 : index
    %c0_9 = arith.constant 0 : index
    %17 = vector.load %arg4[%c0_8, %c0_9] : memref<4x1xf32, #tpu.memory_space<vmem>>, vector<4x1xf32>
    %18 = vector.broadcast %5 : vector<1x256xf32> to vector<4x256xf32>
    %19 = arith.subf %1, %18 : vector<4x256xf32>
    %20 = vector.broadcast %15 : vector<1x256xf32> to vector<4x256xf32>
    %21 = arith.mulf %19, %20 : vector<4x256xf32>
    %22 = vector.broadcast %16 : vector<4x1xf32> to vector<4x256xf32>
    %23 = arith.mulf %21, %22 : vector<4x256xf32>
    %24 = vector.broadcast %17 : vector<4x1xf32> to vector<4x256xf32>
    %25 = arith.addf %23, %24 : vector<4x256xf32>
    %c0_10 = arith.constant 0 : index
    %c0_11 = arith.constant 0 : index
    %c0_12 = arith.constant 0 : index
    %26 = vector.load %arg5[%c0_10, %c0_11, %c0_12] : memref<1x4x256xf32, #tpu.memory_space<vmem>>, vector<1x4x256xf32>
    %27 = vector.shape_cast %26 : vector<1x4x256xf32> to vector<4x256xf32>
    %28 = vector.shape_cast %25 : vector<4x256xf32> to vector<1x4x256xf32>
    tpu.vector_store %arg5[%c0_10, %c0_11, %c0_12], %28 {strides = array<i32>} : memref<1x4x256xf32, #tpu.memory_space<vmem>>, vector<1x4x256xf32>,
    return
  }
  func.func @transform_0(%arg0: i32, %arg1: i32) -> (i32, i32, i32) {
    %c0_i32 = arith.constant 0 : i32
    %c0_i32_0 = arith.constant 0 : i32
    return %arg0, %c0_i32, %arg1 : i32, i32, i32
  }
  func.func @transform_1(%arg0: i32, %arg1: i32) -> (i32, i32) {
    %c0_i32 = arith.constant 0 : i32
    %c0_i32_0 = arith.constant 0 : i32
    %c0_i32_1 = arith.constant 0 : i32
    return %c0_i32, %c0_i32_0 : i32, i32
  }
  func.func @transform_2(%arg0: i32, %arg1: i32) -> (i32, i32) {
    %c0_i32 = arith.constant 0 : i32
    %c0_i32_0 = arith.constant 0 : i32
    %c0_i32_1 = arith.constant 0 : i32
    return %c0_i32, %c0_i32_0 : i32, i32
  }
  func.func @transform_3(%arg0: i32, %arg1: i32) -> (i32, i32, i32) {
    %c0_i32 = arith.constant 0 : i32
    %c0_i32_0 = arith.constant 0 : i32
    return %arg0, %c0_i32, %arg1 : i32, i32, i32
  }
}

</mosaic_0001>

<bundles_post_ra>
// kernel: tpu_custom_call.1
= control target key start
LH: loop header
LB: loop body
LE: loop exit
PB: predicated region body
PF: predicated region fallthrough
CT: control target
= control target key end

     0   :  { %8 = vsyncpa [#allocation3], 0  ;;  %s761_s0 = inlined_call_operand.hbm [shape: f32[2,4,256], index: 0, kind: input, shape index: {}]   ;;  %s762_s1 = inlined_call_operand.vmem [shape: f32[4,1], index: 1, kind: input, shape index: {}]   ;;  %s763_s2 = inlined_call_operand.vmem [shape: f32[4,1], index: 2, kind: input, shape index: {}]   ;;  %s764_s3 = inlined_call_operand.hbm [shape: f32[2,4,256], index: 3, kind: output, shape index: {}]  }
   0x1   :  { %10 = vsyncpa [#allocation3 + $0x1], 0 }
   0x2   :  { %11 = vsyncpa [#allocation4], 0 }
   0x3   :  { %13 = vsyncpa [#allocation4 + $0x1], 0  ;;  %s617_s12 = smov 0   ;;  %s619_s13 = smov 0  }
   0x4   :  { %s621_s14 = smov 0   ;;  %s623_s15 = smov 0  }
   0x5   :  { %s625_s16 = smov 0   ;;  %s627_s17 = smov 0  }
   0x6 LB: > { %s396_s18 = sadd.s32 4294967295, %s591_s17   ;;  %s397_s19 = sadd.s32 4294967294, %s591_s17   ;;  %s591_s17 = sphi %s627_s17, %s19_s17   ;;  %s587_s16 = sphi %s625_s16, %s776_s16   ;;  %s583_s15 = sphi %s623_s15, %s775_s15   ;;  %s579_s14 = sphi %s621_s14, %s774_s14   ;;  %s575_s13 = sphi %s619_s13, %s773_s13   ;;  %s571_s12 = sphi %s617_s12, %s772_s12  }
   0x7   : > { %s31_s20 = sadd.s32 1, %s587_s16  ;;  %s40_s21 = sadd.s32 1, %s579_s14 }
   0x8   : > { %p33_p0 = scmp.ge.s32.totalorder %s31_s20, 2  ;;  %p47_p1 = scmp.ne.s32.totalorder %s579_s14, %s575_s13 }
   0x9   : > { %p48_p2 = scmp.eq.s32.totalorder %s591_s17, 0  ;;  %p53_p3 = scmp.ne.s32.totalorder %s575_s13, %s571_s12 }
   0xa   : > { %s778_s20 = smov (%p33_p0, %s31_s20), 0  ;;  %p54_p5 = scmp.eq.s32.totalorder %s396_s18, 0 }
   0xb   : > { %p658_p4 = por %p48_p2, %p47_p1  ;;  %s35_s23 = ssub.s32 %s587_s16, %s778_s20 }
   0xc   : > { %p121_p6 = scmp.eq.s32.totalorder %s396_s18, 1  ;;  %p38_p7 = scmp.eq.s32.totalorder %s35_s23, 0 }
   0xd   : > { %p664_p8 = por %p54_p5, %p53_p3  ;;  %p127_p10 = scmp.eq.s32.totalorder %s397_s19, 1 }
   0xe   : > { %p668_p9 = por %p121_p6, %p47_p1  ;;  %p425_p13 = scmp.lt.s32.totalorder %s591_s17, 2 }
   0xf   : > { %s673_s26 = scalar_select %p38_p7, %s579_s14, %s40_s21  }
  0x10   : > { %p675_p11 = por %p127_p10, %p53_p3  ;;  %s153_s28 = sand.u32 1, %s579_s14  }
  0x11   : > { %s400_s29 = sshll.u32 %s153_s28, 3  ;;  %s411_s30 = sshll.u32 %s587_s16, 7 }
  0x12   : > { %s768_s27 = scalar_select %p675_p11, 1, 0 }
  0x13   : > { %s165_s6 = scalar_lea.hbm %s761_s0, %s411_s30  ;;  %s157_s7 = scalar_lea.vmem [#allocation2], %s400_s29 }
  0x14   : > { %s167_s8 = sshll.u32 %s157_s7, 4  ;;  %p688_p0 = pnand %p425_p13, %p658_p4  ;;  %s168_s8 = int_to_ptr.vmem [resolvable:$true] %s167_s8 }
  0x15   : > { %p403_p1 = scmp.ge.s32.totalorder %s591_s17, 1  ;;  %p172_p2 = scmp.lt.s32.totalorder %s591_s17, 3 }
  0x16   : > { %s154_s10 = scalar_lea.sflag [#allocation3], %s153_s28  ;;  %p485_p3 = pneg %p688_p0 }
  0x17   : > { %s496_s11 = scalar_lea.vmem %s168_s8, 128  ;;  %s593_s18 = smov [#allocation2]  }
  0x18   : > { %p497_p5 = scmp.ne.s32.totalorder %s168_s8, %s496_s11  ;;  %s501_s19 = sshll.u32 %s593_s18, 4  ;;  %s502_s19 = int_to_ptr.vmem [resolvable:$false] %s501_s19 }
  0x19   : > { %s503_s21 = scalar_lea.vmem %s502_s19, 256  ;;  %p504_p10 = scmp.lt.s32.totalorder %s168_s8, %s502_s19 }
  0x1a   : > { %p499_p6 = pnand %p497_p5, %p485_p3  ;;  %p505_p12 = scmp.lt.s32.totalorder %s503_s21, %s496_s11 }
  0x1c   : > { %p500_p7 = pneg %p499_p6  ;;  %p506_p4 = por %p505_p12, %p504_p10 }
  0x1e   : > { %p507_p13 = pnand %p506_p4, %p500_p7 }
  0x20   : > { %510 = shalt.err (!%p507_p13)
}
  0x21   : > { %420 = dma.hbm_to_vmem [thread:$0]  (!%p688_p0), %s165_s6, 128, %s168_s8, %s154_s10  }
  0x22   : > { %p173_p11 = pnand %p403_p1, %p172_p2 }
  0x23   : > { %s703_s22 = sand.u32 (!%p173_p11), 1, %s575_s13  }
  0x24   : > { %176 = sbr.rel (%p173_p11) target bundleno = 189 (0xbd), region = 32  ;;  %s404_s23 = sshll.u32 (!%p173_p11), %s703_s22, 3 }
  0x25   : > { %s179_s28 = scalar_lea.sflag (!%p173_p11), [#allocation3], %s703_s22  ;;  %s182_s29 = scalar_lea.vmem (!%p173_p11), [#allocation2], %s404_s23 }
  0x29   : > { %562 = dma.done.wait (%p664_p8), %s179_s28, 128  }
  0x2a   : > { %564 = vsyncadd (%p664_p8), %s179_s28, 4294967168  ;;  %v594_v0 = vmov 0   ;;  %v256_v1 = vld [vmem:[%s762_s1] sm:$0xf]  ;;  %vm211_vm0 = vcmask 1043456   ;;  %v275_v47 = vlaneseq  ;;  %s412_s24 = sshll.u32 %s583_s15, 7 }
  0x2b   : > { %477 = vset.pattern.permute.xlu0 %v594_v0  ;;  %v257_v2 = vld [vmem:[%s763_s2] sm:$0xf]  ;;  %v595_v45 = vmov 839922192   ;;  %s204_s7 = scalar_lea.vmem [#allocation5], %s404_s23  ;;  %s310_s11 = scalar_lea.hbm %s764_s3, %s412_s24 }
  0x2c   : > { %270 = vperm.xlu0 %477, %v256_v1   ;;  %v207_v3 = vld [vmem:[%s182_s29] sm:$0xff]  ;;  %v273_v46 = vunpack.c.l.s4 %v595_v45  ;;  %v276_v50 = vshrl.u32 %v275_v47, 7  ;;  %s312_s8 = sshll.u32 %s204_s7, 4  ;;  %s296_s18 = scalar_lea.sflag [#allocation4], %s703_s22  ;;  %s313_s8 = int_to_ptr.vmem [resolvable:$true] %s312_s8 }
  0x2d   : > { %v209_v4 = vcombine.high %v207_v3, %v207_v3  ;;  %v228_v5 = vmul.f32 %v207_v3, %v207_v3  ;;  %v212_v6 = vsel %vm211_vm0, %v207_v3, 0.0  ;;  %s511_s19 = scalar_lea.vmem %s313_s8, 128  ;;  %s596_s21 = smov [#allocation5]  }
  0x2e   : > { %v213_v9 = vrot.slane %v212_v6, 4  ;;  %v274_v49 = vunpack.c.0.s8 %v273_v46  ;;  %p512_p8 = scmp.ne.s32.totalorder %s313_s8, %s511_s19  ;;  %s515_s15 = sshll.u32 %s596_s21, 4  ;;  %s516_s15 = int_to_ptr.vmem [resolvable:$false] %s515_s15 }
  0x2f   : > { %v219_v7 = vsel %vm211_vm0, %v209_v4, 0.0  ;;  %v230_v8 = vcombine.high %v228_v5, %v228_v5  ;;  %v232_v11 = vsel %vm211_vm0, %v228_v5, 0.0  ;;  %s517_s23 = scalar_lea.vmem %s516_s15, 256  ;;  %p518_p0 = scmp.lt.s32.totalorder %s313_s8, %s516_s15 }
  0x30   : > { %283 = vperm.xlu0 %477, %v257_v2   ;;  %v220_v10 = vrot.slane %v219_v7, 4  ;;  %v214_v13 = vadd.f32 %v213_v9, %v212_v6  ;;  %v233_v14 = vrot.slane %v232_v11, 4  ;;  %v277_v53 = vsub.s32 %v274_v49, %v276_v50  ;;  %p513_p11 = pnand %p512_p8, %p668_p9  ;;  %p519_p1 = scmp.lt.s32.totalorder %s517_s23, %s511_s19 }
  0x31   : > { %v239_v12 = vsel %vm211_vm0, %v230_v8, 0.0 }
  0x32   : > { %v221_v15 = vadd.f32 %v220_v10, %v219_v7  ;;  %v240_v16 = vrot.slane %v239_v12, 4  ;;  %v215_v17 = vrot.slane %v214_v13, 2  ;;  %v234_v18 = vadd.f32 %v233_v14, %v232_v11  ;;  %p514_p12 = pneg %p513_p11  ;;  %p520_p2 = por %p519_p1, %p518_p0 }
  0x34   : > { %v222_v19 = vrot.slane %v221_v15, 2  ;;  %v241_v20 = vadd.f32 %v240_v16, %v239_v12  ;;  %v216_v21 = vadd.f32 %v215_v17, %v214_v13  ;;  %v235_v22 = vrot.slane %v234_v18, 2  ;;  %p521_p3 = pnand %p520_p2, %p514_p12 }
  0x36   : > { %v223_v23 = vadd.f32 %v222_v19, %v221_v15  ;;  %v242_v24 = vrot.slane %v241_v20, 2  ;;  %v217_v25 = vrot.slane %v216_v21, 1  ;;  %v236_v26 = vadd.f32 %v235_v22, %v234_v18 }
  0x38   : > { %v224_v27 = vrot.slane %v223_v23, 1  ;;  %v243_v28 = vadd.f32 %v242_v24, %v241_v20  ;;  %v218_v29 = vadd.f32 %v217_v25, %v216_v21  ;;  %v237_v30 = vrot.slane %v236_v26, 1 }
  0x3a   : > { %v225_v31 = vadd.f32 %v224_v27, %v223_v23  ;;  %v244_v32 = vrot.slane %v243_v28, 1  ;;  %v226_v33 = vmul.f32 0.25, %v218_v29  ;;  %v238_v34 = vadd.f32 %v237_v30, %v236_v26 }
  0x3c   : > { %v227_v35 = vmul.f32 0.25, %v225_v31  ;;  %v245_v36 = vadd.f32 %v244_v32, %v243_v28  ;;  %v246_v37 = vmul.f32 0.25, %v238_v34  ;;  %v248_v38 = vmul.f32 %v226_v33, %v226_v33 }
  0x3e   : > { %v247_v39 = vmul.f32 0.25, %v245_v36  ;;  %v249_v40 = vmul.f32 %v227_v35, %v227_v35  ;;  %v250_v41 = vsub.f32 %v246_v37, %v248_v38  ;;  %v260_v51 = vcombine.low %v226_v33, %v227_v35 }
  0x40   : > { %v251_v42 = vsub.f32 %v247_v39, %v249_v40  ;;  %v252_v43 = vadd.f32 1e-05, %v250_v41  ;;  %v262_v54 = vsub.f32 %v207_v3, %v260_v51 }
  0x42   : > { %v253_v44 = vadd.f32 1e-05, %v251_v42  ;;  %479 = vrsqrt.f32 %v252_v43 }
  0x44   : > { %481 = vrsqrt.f32 %v253_v44 }
  0x4f   : > { %v480_v48 = vpop.eup %479 }
  0x51   : > { %v482_v52 = vpop.eup %481 }
  0x52   : > { %v265_v55 = vcombine.low %v480_v48, %v482_v52 }
  0x54   : > { %v267_v57 = vmul.f32 %v265_v55, %v262_v54 }
  0xa7   : > { %v271_v56 = vpop.permute.xlu0 %270 }
  0xa8   : > { %v278_v58 = vrot.slane %v271_v56, %v277_v53 }
  0xaa   : > { %v280_v60 = vmul.f32 %v278_v58, %v267_v57 }
  0xab   : > { %v284_v59 = vpop.permute.xlu0 %283 }
  0xac   : > { %v291_v61 = vrot.slane %v284_v59, %v277_v53 }
  0xae   : > { %v293_v62 = vadd.f32 %v291_v61, %v280_v60 }
  0xb0   : > { %294 = vst [vmem:[%s204_s7] sm:$0xff] %v293_v62 }
  0xb1   : > { %524 = shalt.err (!%p521_p3)
}
  0xb2   : > { %s525_s28 = scalar_lea.hbm %s310_s11, 128  ;;  %s529_s30 = scalar_lea.hbm %s764_s3, 256 }
  0xb3   : > { %p526_p5 = scmp.ne.s32.totalorder %s310_s11, %s525_s28  ;;  %p530_p10 = scmp.lt.s32.totalorder %s310_s11, %s764_s3 }
  0xb4   : > { %p531_p4 = scmp.lt.s32.totalorder %s529_s30, %s525_s28 }
  0xb5   : > { %p527_p6 = pnand %p526_p5, %p668_p9 }
  0xb6   : > { %p532_p13 = por %p531_p4, %p530_p10 }
  0xb7   : > { %p528_p7 = pneg %p527_p6 }
  0xb9   : > { %p533_p8 = pnand %p532_p13, %p528_p7 }
  0xbb   : > { %536 = shalt.err (!%p533_p8)
}
  0xbc   : > { %415 = dma.vmem_to_hbm [thread:$0]  (%p668_p9), %s313_s8, 128, %s310_s11, %s296_s18  }
  0xbd PF: > { %s324_s6 = sand.u32 1, %s571_s12   ;;  %p770_p11 = scmp.ne.s32.totalorder %s768_s27, 0 }
  0xbe   : > { %p771_p12 = scmp.ge.s32.totalorder %s591_s17, 2  ;;  %s325_s24 = scalar_lea.sflag [#allocation4], %s324_s6 }
  0xc0   : > { %p422_p0 = pnand %p771_p12, %p770_p11 }
  0xc2   : > { %p423_p1 = pneg %p422_p0 }
  0xc4   : > { %566 = dma.done.wait (%p423_p1), %s325_s24, 128  }
  0xc5   : > { %568 = vsyncadd (%p423_p1), %s325_s24, 4294967168  ;;  %s19_s17 = sadd.s32 1, %s591_s17   ;;  %s772_s12 = smov %s575_s13 }
  0xc6   : > { %p16_p2 = scmp.ge.s32.totalorder %s19_s17, 4   ;;  %s773_s13 = smov %s579_s14 }
  0xc7   : > { %s774_s14 = smov %s673_s26  ;;  %s775_s15 = smov %s587_s16 }
  0xc8   : > { %s776_s16 = smov %s778_s20  ;;  %18 = sbr.rel (!%p16_p2) target bundleno = 6 (0x6), region = 77 }
  0xcd   :  { %330 = vsyncpa [#allocation3], 1 }
  0xce   :  { %332 = vsyncpa [#allocation3 + $0x1], 1 }
  0xcf   :  { %333 = vsyncpa [#allocation4], 1 }
  0xd0   :  { %335 = vsyncpa [#allocation4 + $0x1], 1 }

</bundles_post_ra>
